<compile_context>
chip_gen: v5e
topology: v5e:2x2
jax: 0.10.0
libtpu: 0.0.40
codegen_flags: <defaults>
</compile_context>

<pallas_src>
import functools

import jax
import jax.numpy as jnp
from jax.experimental import pallas as pl
from jax.experimental.pallas import tpu as pltpu


def _round_up(x, m):
    return (x + m - 1) // m * m


def _actor_kernel(x_ref, w1_ref, b1_ref, w2_ref, b2_ref, w3_ref, b3_ref,
                  out_ref, *, output_dim):
    # bf16 operands -> MXU with f32 accumulation; bias/ReLU/softmax in f32.
    x = x_ref[...]                                                        # (TM, Dp) bf16
    h1 = jnp.dot(x, w1_ref[...], preferred_element_type=jnp.float32) + b1_ref[...]
    h1 = jnp.maximum(h1, 0.0).astype(jnp.bfloat16)                        # (TM, Hp)
    h2 = jnp.dot(h1, w2_ref[...], preferred_element_type=jnp.float32) + b2_ref[...]
    h2 = jnp.maximum(h2, 0.0).astype(jnp.bfloat16)                        # (TM, Hp)
    logits = jnp.dot(h2, w3_ref[...], preferred_element_type=jnp.float32) + b3_ref[...]

    # Numerically-stable softmax over the real output columns only; padded
    # lanes are forced to -inf so they contribute exp(.) == 0.
    col = jax.lax.broadcasted_iota(jnp.int32, logits.shape, 1)
    logits = jnp.where(col < output_dim, logits, -jnp.inf)
    m = jnp.max(logits, axis=-1, keepdims=True)
    p = jnp.exp(logits - m)
    out_ref[...] = (p / jnp.sum(p, axis=-1, keepdims=True)).astype(out_ref.dtype)


def actor_forward(state, params, *, tm=512):
    """Forward pass of ActorNetwork.

    state: [B, input_dim] or [input_dim] float32
    params: dict with w1 [D,H], b1 [1,H], w2 [H,H], b2 [1,H], w3 [H,O], b3 [1,O]
            (weights stored [in_features, out_features], i.e. transposed wrt
             torch's nn.Linear so the kernel does y = x @ W + b directly)
    returns: [B, output_dim] float32 softmax probabilities (B=1 if input 1-D).
    """
    w1, b1, w2, b2, w3, b3 = (params[k] for k in ("w1", "b1", "w2", "b2", "w3", "b3"))
    input_dim, hidden = w1.shape
    output_dim = w3.shape[1]

    # Lane-pad every feature dim to a multiple of 128 (full vregs, dense stores).
    d_pad = _round_up(input_dim, 128)
    h_pad = _round_up(hidden, 128)
    o_pad = _round_up(output_dim, 128)

    # Mirror torch's view(1, input_dim) / view(-1, input_dim) glue.
    x = state.reshape(1, input_dim) if state.ndim == 1 else state.reshape(-1, input_dim)
    b = x.shape[0]

    # Batch tile: as large as possible to amortize per-grid-step overhead, but
    # keep >= 2 grid steps for larger batches so both v7x TensorCores get work.
    b_tile = min(tm, _round_up(b, 8))
    if b >= 16:
        b_tile = min(b_tile, _round_up(pl.cdiv(b, 2), 8))
    b_pad = _round_up(b, b_tile)

    # Zero-padding is exact: padded input/hidden units are ReLU(0) = 0 and feed
    # zero weight rows; padded output columns are masked in the kernel softmax.
    xp = jnp.pad(x, ((0, b_pad - b), (0, d_pad - input_dim))).astype(jnp.bfloat16)
    w1p = jnp.pad(w1, ((0, d_pad - input_dim), (0, h_pad - hidden))).astype(jnp.bfloat16)
    w2p = jnp.pad(w2, ((0, h_pad - hidden), (0, h_pad - hidden))).astype(jnp.bfloat16)
    w3p = jnp.pad(w3, ((0, h_pad - hidden), (0, o_pad - output_dim))).astype(jnp.bfloat16)
    b1p = jnp.pad(b1, ((0, 0), (0, h_pad - hidden)))
    b2p = jnp.pad(b2, ((0, 0), (0, h_pad - hidden)))
    b3p = jnp.pad(b3, ((0, 0), (0, o_pad - output_dim)))

    grid = (b_pad // b_tile,)
    out = pl.pallas_call(
        functools.partial(_actor_kernel, output_dim=output_dim),
        out_shape=jax.ShapeDtypeStruct((b_pad, o_pad), jnp.float32),
        grid_spec=pltpu.PrefetchScalarGridSpec(
            num_scalar_prefetch=0,
            grid=grid,
            in_specs=[
                pl.BlockSpec((b_tile, d_pad), lambda i: (i, 0)),   # x tile
                pl.BlockSpec((d_pad, h_pad), lambda i: (0, 0)),    # w1 (resident)
                pl.BlockSpec((1, h_pad), lambda i: (0, 0)),        # b1
                pl.BlockSpec((h_pad, h_pad), lambda i: (0, 0)),    # w2
                pl.BlockSpec((1, h_pad), lambda i: (0, 0)),        # b2
                pl.BlockSpec((h_pad, o_pad), lambda i: (0, 0)),    # w3
                pl.BlockSpec((1, o_pad), lambda i: (0, 0)),        # b3
            ],
            out_specs=pl.BlockSpec((b_tile, o_pad), lambda i: (i, 0)),
        ),
        compiler_params=pltpu.CompilerParams(
            dimension_semantics=("parallel",)
        ),
    )(xp, w1p, b1p, w2p, b2p, w3p, b3p)

    return out[:b, :output_dim]


def init_actor_params(key, input_dim, hidden_dim, output_dim):
    """Deterministic init mimicking nn.Linear's U(-1/sqrt(fan_in), 1/sqrt(fan_in))."""
    ks = jax.random.split(key, 6)

    def uniform(k, shape, fan_in):
        bound = 1.0 / jnp.sqrt(jnp.float32(fan_in))
        return jax.random.uniform(k, shape, jnp.float32, -bound, bound)

    return {
        "w1": uniform(ks[0], (input_dim, hidden_dim), input_dim),
        "b1": uniform(ks[1], (1, hidden_dim), input_dim),
        "w2": uniform(ks[2], (hidden_dim, hidden_dim), hidden_dim),
        "b2": uniform(ks[3], (1, hidden_dim), hidden_dim),
        "w3": uniform(ks[4], (hidden_dim, output_dim), hidden_dim),
        "b3": uniform(ks[5], (1, output_dim), hidden_dim),
    }


def actor_ref(state, params):
    """Pure-JAX reference with matching bf16 operand / f32 accumulate precision."""
    input_dim = params["w1"].shape[0]
    x = state.reshape(1, input_dim) if state.ndim == 1 else state.reshape(-1, input_dim)
    xb = x.astype(jnp.bfloat16)
    w1 = params["w1"].astype(jnp.bfloat16)
    w2 = params["w2"].astype(jnp.bfloat16)
    w3 = params["w3"].astype(jnp.bfloat16)
    h1 = jnp.maximum(jnp.dot(xb, w1, preferred_element_type=jnp.float32) + params["b1"], 0.0)
    h1 = h1.astype(jnp.bfloat16)
    h2 = jnp.maximum(jnp.dot(h1, w2, preferred_element_type=jnp.float32) + params["b2"], 0.0)
    h2 = h2.astype(jnp.bfloat16)
    logits = jnp.dot(h2, w3, preferred_element_type=jnp.float32) + params["b3"]
    m = jnp.max(logits, axis=-1, keepdims=True)
    p = jnp.exp(logits - m)
    return p / jnp.sum(p, axis=-1, keepdims=True)


if __name__ == "__main__":
    input_dim = 16
    hidden_dim = 32
    output_dim = 4
    batch = 8

    key = jax.random.PRNGKey(0)
    k_params, k_state = jax.random.split(key)

    params = init_actor_params(k_params, input_dim, hidden_dim, output_dim)
    state = jax.random.normal(k_state, (batch, input_dim), dtype=jnp.float32)

    probs = jax.block_until_ready(actor_forward(state, params))
    assert probs.shape == (batch, output_dim), probs.shape
    assert bool(jnp.allclose(jnp.sum(probs, axis=-1), 1.0, atol=1e-4)), "rows must sum to 1"

    ref = actor_ref(state, params)
    assert bool(jnp.allclose(probs, ref, atol=1e-4, rtol=1e-3)), (
        "mismatch vs reference", probs, ref)

    # Also exercise the 1-D input path (state.dim() == 1 in torch).
    p1 = jax.block_until_ready(actor_forward(state[0], params))
    assert p1.shape == (1, output_dim), p1.shape
    assert bool(jnp.allclose(p1, ref[:1], atol=1e-4, rtol=1e-3))

    print("KERNEL_OK")
</pallas_src>

<mosaic_0001>
module attributes {stable_mosaic.version = 11 : i64} {
  func.func @_actor_kernel(%arg0: i32, %arg1: memref<8x128xbf16, #tpu.memory_space<vmem>>, %arg2: memref<128x128xbf16, #tpu.memory_space<vmem>>, %arg3: memref<1x128xf32, #tpu.memory_space<vmem>>, %arg4: memref<128x128xbf16, #tpu.memory_space<vmem>>, %arg5: memref<1x128xf32, #tpu.memory_space<vmem>>, %arg6: memref<128x128xbf16, #tpu.memory_space<vmem>>, %arg7: memref<1x128xf32, #tpu.memory_space<vmem>>, %arg8: memref<8x128xf32, #tpu.memory_space<vmem>>) attributes {dimension_semantics = [#tpu.dimension_semantics<parallel>], iteration_bounds = array<i64: 1>, scalar_prefetch = 0 : i64, scratch_operands = 0 : i64, tpu.core_type = #tpu.core_type<tc>, window_params = [{transform_indices = @transform_0, window_bounds = array<i64: 8, 128>}, {pipeline_mode = #tpu.pipeline_mode<synchronous>, transform_indices = @transform_1, window_bounds = array<i64: 128, 128>}, {pipeline_mode = #tpu.pipeline_mode<synchronous>, transform_indices = @transform_2, window_bounds = array<i64: 1, 128>}, {pipeline_mode = #tpu.pipeline_mode<synchronous>, transform_indices = @transform_3, window_bounds = array<i64: 128, 128>}, {pipeline_mode = #tpu.pipeline_mode<synchronous>, transform_indices = @transform_4, window_bounds = array<i64: 1, 128>}, {pipeline_mode = #tpu.pipeline_mode<synchronous>, transform_indices = @transform_5, window_bounds = array<i64: 128, 128>}, {pipeline_mode = #tpu.pipeline_mode<synchronous>, transform_indices = @transform_6, window_bounds = array<i64: 1, 128>}, {transform_indices = @transform_7, window_bounds = array<i64: 8, 128>}]} {
    %c0 = arith.constant 0 : index
    %c0_0 = arith.constant 0 : index
    %0 = vector.load %arg1[%c0, %c0_0] : memref<8x128xbf16, #tpu.memory_space<vmem>>, vector<8x128xbf16>
    %c0_1 = arith.constant 0 : index
    %c0_2 = arith.constant 0 : index
    %1 = vector.load %arg2[%c0_1, %c0_2] : memref<128x128xbf16, #tpu.memory_space<vmem>>, vector<128x128xbf16>
    %cst = arith.constant dense<0.000000e+00> : vector<8x128xf32>
    %2 = tpu.matmul %0, %1, %cst {dimension_numbers = #tpu.dot_dimension_numbers<[1], [0], [0], [1], [0, 0, 1, 1], [], []>} : vector<8x128xbf16>, vector<128x128xbf16>, vector<8x128xf32> -> vector<8x128xf32>
    %c0_3 = arith.constant 0 : index
    %c0_4 = arith.constant 0 : index
    %3 = vector.load %arg3[%c0_3, %c0_4] : memref<1x128xf32, #tpu.memory_space<vmem>>, vector<1x128xf32>
    %4 = vector.broadcast %3 : vector<1x128xf32> to vector<8x128xf32>
    %5 = arith.addf %2, %4 : vector<8x128xf32>
    %cst_5 = arith.constant 0.000000e+00 : f32
    %6 = vector.broadcast %cst_5 : f32 to vector<8x128xf32>
    %7 = arith.maximumf %5, %6 : vector<8x128xf32>
    %8 = arith.truncf %7 : vector<8x128xf32> to vector<8x128xbf16>
    %c0_6 = arith.constant 0 : index
    %c0_7 = arith.constant 0 : index
    %9 = vector.load %arg4[%c0_6, %c0_7] : memref<128x128xbf16, #tpu.memory_space<vmem>>, vector<128x128xbf16>
    %cst_8 = arith.constant dense<0.000000e+00> : vector<8x128xf32>
    %10 = tpu.matmul %8, %9, %cst_8 {dimension_numbers = #tpu.dot_dimension_numbers<[1], [0], [0], [1], [0, 0, 1, 1], [], []>} : vector<8x128xbf16>, vector<128x128xbf16>, vector<8x128xf32> -> vector<8x128xf32>
    %c0_9 = arith.constant 0 : index
    %c0_10 = arith.constant 0 : index
    %11 = vector.load %arg5[%c0_9, %c0_10] : memref<1x128xf32, #tpu.memory_space<vmem>>, vector<1x128xf32>
    %12 = vector.broadcast %11 : vector<1x128xf32> to vector<8x128xf32>
    %13 = arith.addf %10, %12 : vector<8x128xf32>
    %cst_11 = arith.constant 0.000000e+00 : f32
    %14 = vector.broadcast %cst_11 : f32 to vector<8x128xf32>
    %15 = arith.maximumf %13, %14 : vector<8x128xf32>
    %16 = arith.truncf %15 : vector<8x128xf32> to vector<8x128xbf16>
    %c0_12 = arith.constant 0 : index
    %c0_13 = arith.constant 0 : index
    %17 = vector.load %arg6[%c0_12, %c0_13] : memref<128x128xbf16, #tpu.memory_space<vmem>>, vector<128x128xbf16>
    %cst_14 = arith.constant dense<0.000000e+00> : vector<8x128xf32>
    %18 = tpu.matmul %16, %17, %cst_14 {dimension_numbers = #tpu.dot_dimension_numbers<[1], [0], [0], [1], [0, 0, 1, 1], [], []>} : vector<8x128xbf16>, vector<128x128xbf16>, vector<8x128xf32> -> vector<8x128xf32>
    %c0_15 = arith.constant 0 : index
    %c0_16 = arith.constant 0 : index
    %19 = vector.load %arg7[%c0_15, %c0_16] : memref<1x128xf32, #tpu.memory_space<vmem>>, vector<1x128xf32>
    %20 = vector.broadcast %19 : vector<1x128xf32> to vector<8x128xf32>
    %21 = arith.addf %18, %20 : vector<8x128xf32>
    %22 = tpu.iota {dimensions = array<i32: 1>} : vector<8x128xi32>
    %c4_i32 = arith.constant 4 : i32
    %23 = vector.broadcast %c4_i32 : i32 to vector<8x128xi32>
    %24 = arith.cmpi slt, %22, %23 : vector<8x128xi32>
    %cst_17 = arith.constant 0xFF800000 : f32
    %25 = vector.broadcast %cst_17 : f32 to vector<8x128xf32>
    %26 = arith.select %24, %21, %25 : vector<8x128xi1>, vector<8x128xf32>
    %cst_18 = arith.constant dense<0xFF800000> : vector<8xf32>
    %27 = vector.multi_reduction <maximumf>, %26, %cst_18 [1] : vector<8x128xf32> to vector<8xf32>
    %28 = vector.shape_cast %27 : vector<8xf32> to vector<8x1xf32>
    %29 = vector.broadcast %28 : vector<8x1xf32> to vector<8x128xf32>
    %30 = arith.subf %26, %29 : vector<8x128xf32>
    %31 = math.exp %30 : vector<8x128xf32>
    %cst_19 = arith.constant dense<0.000000e+00> : vector<8xf32>
    %32 = vector.multi_reduction <add>, %31, %cst_19 [1] : vector<8x128xf32> to vector<8xf32>
    %33 = vector.shape_cast %32 : vector<8xf32> to vector<8x1xf32>
    %34 = vector.broadcast %33 : vector<8x1xf32> to vector<8x128xf32>
    %35 = arith.divf %31, %34 : vector<8x128xf32>
    %c0_20 = arith.constant 0 : index
    %c0_21 = arith.constant 0 : index
    %36 = vector.load %arg8[%c0_20, %c0_21] : memref<8x128xf32, #tpu.memory_space<vmem>>, vector<8x128xf32>
    tpu.vector_store %arg8[%c0_20, %c0_21], %35 {strides = array<i32>} : memref<8x128xf32, #tpu.memory_space<vmem>>, vector<8x128xf32>,
    return
  }
  func.func @transform_0(%arg0: i32) -> (i32, i32) {
    %c0_i32 = arith.constant 0 : i32
    %c0_i32_0 = arith.constant 0 : i32
    return %arg0, %c0_i32 : i32, i32
  }
  func.func @transform_1(%arg0: i32) -> (i32, i32) {
    %c0_i32 = arith.constant 0 : i32
    %c0_i32_0 = arith.constant 0 : i32
    %c0_i32_1 = arith.constant 0 : i32
    return %c0_i32, %c0_i32_0 : i32, i32
  }
  func.func @transform_2(%arg0: i32) -> (i32, i32) {
    %c0_i32 = arith.constant 0 : i32
    %c0_i32_0 = arith.constant 0 : i32
    %c0_i32_1 = arith.constant 0 : i32
    return %c0_i32, %c0_i32_0 : i32, i32
  }
  func.func @transform_3(%arg0: i32) -> (i32, i32) {
    %c0_i32 = arith.constant 0 : i32
    %c0_i32_0 = arith.constant 0 : i32
    %c0_i32_1 = arith.constant 0 : i32
    return %c0_i32, %c0_i32_0 : i32, i32
  }
  func.func @transform_4(%arg0: i32) -> (i32, i32) {
    %c0_i32 = arith.constant 0 : i32
    %c0_i32_0 = arith.constant 0 : i32
    %c0_i32_1 = arith.constant 0 : i32
    return %c0_i32, %c0_i32_0 : i32, i32
  }
  func.func @transform_5(%arg0: i32) -> (i32, i32) {
    %c0_i32 = arith.constant 0 : i32
    %c0_i32_0 = arith.constant 0 : i32
    %c0_i32_1 = arith.constant 0 : i32
    return %c0_i32, %c0_i32_0 : i32, i32
  }
  func.func @transform_6(%arg0: i32) -> (i32, i32) {
    %c0_i32 = arith.constant 0 : i32
    %c0_i32_0 = arith.constant 0 : i32
    %c0_i32_1 = arith.constant 0 : i32
    return %c0_i32, %c0_i32_0 : i32, i32
  }
  func.func @transform_7(%arg0: i32) -> (i32, i32) {
    %c0_i32 = arith.constant 0 : i32
    %c0_i32_0 = arith.constant 0 : i32
    return %arg0, %c0_i32 : i32, i32
  }
}

</mosaic_0001>

<bundles_post_ra>
// kernel: tpu_custom_call.1
= control target key start
LH: loop header
LB: loop body
LE: loop exit
PB: predicated region body
PF: predicated region fallthrough
CT: control target
= control target key end

     0   :  { %12 = vsyncpa [#allocation3], 0  ;;  %s715_s0 = inlined_call_operand.hbm [shape: bf16[8,128], index: 0, kind: input, shape index: {}]   ;;  %s716_s1 = inlined_call_operand.hbm [shape: bf16[128,128], index: 1, kind: input, shape index: {}]   ;;  %s717_s2 = inlined_call_operand.vmem [shape: f32[1,128], index: 2, kind: input, shape index: {}]   ;;  %s718_s3 = inlined_call_operand.hbm [shape: bf16[128,128], index: 3, kind: input, shape index: {}]   ;;  %s719_s4 = inlined_call_operand.vmem [shape: f32[1,128], index: 4, kind: input, shape index: {}]   ;;  %s720_s5 = inlined_call_operand.hbm [shape: bf16[128,128], index: 5, kind: input, shape index: {}]   ;;  %s721_s6 = inlined_call_operand.vmem [shape: f32[1,128], index: 6, kind: input, shape index: {}]   ;;  %s722_s7 = inlined_call_operand.hbm [shape: f32[8,128], index: 7, kind: output, shape index: {}]  }
   0x1   :  { %13 = vsyncpa [#allocation6], 0 }
   0x2   :  { %14 = vsyncpa [#allocation9], 0  ;;  %s31_s26 = sshll.u32 %s716_s1, 4  ;;  %s32_s26 = int_to_ptr.hbm [resolvable:$true] %s31_s26 }
   0x3   :  { %15 = vsyncpa [#allocation4], 0  ;;  %s644_s27 = smov [#allocation5]   ;;  %s21_s8 = sshll.u32 %s715_s0, 4  ;;  %s22_s8 = int_to_ptr.hbm [resolvable:$true] %s21_s8 }
   0x4   :  { %s33_s28 = sshll.u32 %s644_s27, 4  ;;  %s645_s9 = smov 64   ;;  %s34_s28 = int_to_ptr.vmem [resolvable:$true] %s33_s28 }
   0x5   :  { %s646_s10 = smov 4   ;;  %s647_s11 = smov [#allocation2]  }
   0x6   :  { %39 = dma.hbm_to_vmem [thread:$0]  %s32_s26, 1024, %s34_s28, [#allocation6], %s645_s9, %s645_s9, %s646_s10  }
   0x7   :  { %s23_s12 = sshll.u32 %s647_s11, 4  ;;  %s46_s15 = sshll.u32 %s718_s3, 4  ;;  %s24_s12 = int_to_ptr.vmem [resolvable:$true] %s23_s12  ;;  %s47_s15 = int_to_ptr.hbm [resolvable:$true] %s46_s15 }
   0x8   :  { %26 = dma.hbm_to_vmem [thread:$0]  %s22_s8, 64, %s24_s12, [#allocation3]  }
   0x9   :  { %s61_s17 = sshll.u32 %s720_s5, 4  ;;  %s648_s18 = smov [#allocation7]   ;;  %s62_s17 = int_to_ptr.hbm [resolvable:$true] %s61_s17 }
   0xa   :  { %s48_s19 = sshll.u32 %s648_s18, 4  ;;  %s649_s0 = smov [#allocation8]   ;;  %s49_s19 = int_to_ptr.vmem [resolvable:$true] %s48_s19 }
   0xb   :  { %54 = dma.hbm_to_vmem [thread:$0]  %s47_s15, 1024, %s49_s19, [#allocation6], %s645_s9, %s645_s9, %s646_s10  }
   0xc   :  { %s63_s20 = sshll.u32 %s649_s0, 4  ;;  %s64_s20 = int_to_ptr.vmem [resolvable:$true] %s63_s20 }
   0xd   :  { %69 = dma.hbm_to_vmem [thread:$0]  %s62_s17, 1024, %s64_s20, [#allocation9], %s645_s9, %s645_s9, %s646_s10  }
   0xe   :  { %636 = dma.done.wait [#allocation3], 64  }
   0xf   :  { %637 = vsyncadd [#allocation3], 4294967232 }
  0x10   :  { %638 = dma.done.wait [#allocation6], 2048  }
  0x11   :  { %639 = vsyncadd [#allocation6], 4294965248 }
  0x12   :  { %640 = dma.done.wait [#allocation9], 1024  }
  0x13   :  { %641 = vsyncadd [#allocation9], 4294966272  ;;  %v485_v0 = vld [vmem:[#allocation5 + $0x38] sm:$0xff]  ;;  %v484_v1 = vld [vmem:[#allocation5 + $0x30] sm:$0xff]  ;;  %v336_v37 = vlaneseq  ;;  %s370_s26 = sshll.u32 %s722_s7, 4  ;;  %s371_s26 = int_to_ptr.hbm [resolvable:$true] %s370_s26 }
  0x14   :  { %157 = vmatpush.bf16.msra.mxu0 %v485_v0  ;;  %v493_v2 = vld [vmem:[#allocation7 + $0x38] sm:$0xff]  ;;  %v492_v3 = vld [vmem:[#allocation7 + $0x30] sm:$0xff]  ;;  %v483_v4 = vld [vmem:[#allocation5 + $0x28] sm:$0xff] }
  0x15   :  { %240 = vmatpush.bf16.msra.mxu1 %v493_v2  ;;  %v491_v5 = vld [vmem:[#allocation7 + $0x28] sm:$0xff]  ;;  %v482_v6 = vld [vmem:[#allocation5 + $0x20] sm:$0xff]  ;;  %v481_v8 = vld [vmem:[#allocation5 + $0x18] sm:$0xff]  ;;  %v337_v38 = vand.u32 127, %v336_v37 }
  0x16   :  { %v490_v7 = vld [vmem:[#allocation7 + $0x20] sm:$0xff]  ;;  %v489_v9 = vld [vmem:[#allocation7 + $0x18] sm:$0xff]  ;;  %v480_v10 = vld [vmem:[#allocation5 + $0x10] sm:$0xff] }
  0x17   :  { %v488_v11 = vld [vmem:[#allocation7 + $0x10] sm:$0xff]  ;;  %v479_v12 = vld [vmem:[#allocation5 + $0x8] sm:$0xff]  ;;  %v478_v13 = vld [vmem:[#allocation5] sm:$0xff]  ;;  %vm338_vm0 = vcmp.lt.s32.totalorder %v337_v38, 4 }
  0x18   :  { %158 = vmatpush.bf16.msra.mxu0 %v484_v1  ;;  %v88_v14 = vld [vmem:[#allocation2] sm:$0xf]  ;;  %v487_v15 = vld [vmem:[#allocation7 + $0x8] sm:$0xff]  ;;  %v486_v16 = vld [vmem:[#allocation7] sm:$0xff] }
  0x19   :  { %241 = vmatpush.bf16.msra.mxu1 %v492_v3  ;;  %v501_v17 = vld [vmem:[#allocation8 + $0x38] sm:$0xff]  ;;  %v500_v18 = vld [vmem:[#allocation8 + $0x30] sm:$0xff]  ;;  %v499_v19 = vld [vmem:[#allocation8 + $0x28] sm:$0xff] }
  0x1a   :  { %323 = vmatpush.bf16.msra.mxu2 %v501_v17  ;;  %v498_v20 = vld [vmem:[#allocation8 + $0x20] sm:$0xff]  ;;  %v497_v21 = vld [vmem:[#allocation8 + $0x18] sm:$0xff]  ;;  %v496_v22 = vld [vmem:[#allocation8 + $0x10] sm:$0xff] }
  0x1b   :  { %v509_v23 = vld [vmem:[%s717_s2] ss:$0 sm:$0xff]  ;;  %v495_v29 = vld [vmem:[#allocation8 + $0x8] sm:$0xff]  ;;  %v494_v30 = vld [vmem:[#allocation8] sm:$0xff] }
  0x1c   :  { %159 = vmatpush.bf16.msra.mxu0 %v483_v4  ;;  %v510_v31 = vld [vmem:[%s719_s4] ss:$0 sm:$0xff]  ;;  %s650_s4 = smov [#allocation10]  }
  0x1d   :  { %242 = vmatpush.bf16.msra.mxu1 %v491_v5  ;;  %v511_v39 = vld [vmem:[%s721_s6] ss:$0 sm:$0xff]  ;;  %s368_s6 = sshll.u32 %s650_s4, 4  ;;  %s369_s6 = int_to_ptr.vmem [resolvable:$true] %s368_s6 }
  0x1e   :  { %324 = vmatpush.bf16.msra.mxu2 %v500_v18 }
  0x20   :  { %160 = vmatpush.bf16.msra.mxu0 %v482_v6 }
  0x21   :  { %243 = vmatpush.bf16.msra.mxu1 %v490_v7 }
  0x22   :  { %325 = vmatpush.bf16.msra.mxu2 %v499_v19 }
  0x24   :  { %161 = vmatpush.bf16.msra.mxu0 %v481_v8 }
  0x25   :  { %244 = vmatpush.bf16.msra.mxu1 %v489_v9 }
  0x26   :  { %326 = vmatpush.bf16.msra.mxu2 %v498_v20 }
  0x28   :  { %162 = vmatpush.bf16.msra.mxu0 %v480_v10 }
  0x29   :  { %245 = vmatpush.bf16.msra.mxu1 %v488_v11 }
  0x2a   :  { %327 = vmatpush.bf16.msra.mxu2 %v497_v21 }
  0x2c   :  { %163 = vmatpush.bf16.msra.mxu0 %v479_v12 }
  0x2d   :  { %246 = vmatpush.bf16.msra.mxu1 %v487_v15 }
  0x2e   :  { %328 = vmatpush.bf16.msra.mxu2 %v496_v22 }
  0x30   :  { %164 = vmatpush.bf16.msra.mxu0 %v478_v13 }
  0x31   :  { %247 = vmatpush.bf16.msra.mxu1 %v486_v16 }
  0x32   :  { %329 = vmatpush.bf16.msra.mxu2 %v495_v29 }
  0x33   :  { %165 = vmatmul.bf16.vlgmr.msra.gmra.mxu0 %v88_v14 }
  0x36   :  { %330 = vmatpush.bf16.msra.mxu2 %v494_v30 }
  0xb0   :  { %v166_v24 = vpop.f32.mrf.mxu0 }
  0xb1   :  { %v167_v25 = vadd.f32 %v509_v23, %v166_v24 }
  0xb3   :  { %v170_v26 = vmax.f32 %v167_v25, 0.0 }
  0xb5   :  { %v171_v27 = vpack.c.bf16 %v170_v26, %v170_v26 }
  0xb7   :  { %248 = vmatmul.bf16.vlgmr.msra.gmra.mxu1 %v171_v27 }
  0xb8   :  { %v168_v28 = vpop.f32.mrf.mxu0 }
 0x134   :  { %v249_v32 = vpop.f32.mrf.mxu1 }
 0x135   :  { %v250_v33 = vadd.f32 %v510_v31, %v249_v32 }
 0x137   :  { %v253_v34 = vmax.f32 %v250_v33, 0.0 }
 0x139   :  { %v254_v35 = vpack.c.bf16 %v253_v34, %v253_v34 }
 0x13b   :  { %331 = vmatmul.bf16.vlgmr.msra.gmra.mxu2 %v254_v35 }
 0x13c   :  { %v251_v36 = vpop.f32.mrf.mxu1 }
 0x1be   :  { %v332_v40 = vpop.f32.mrf.mxu2 }
 0x1bf   :  { %v333_v41 = vadd.f32 %v511_v39, %v332_v40 }
 0x1c1   :  { %v339_v42 = vsel %vm338_vm0, %v333_v41, -inf }
 0x1c2   :  { %340 = vmax.xlane.f32.xlu0 %v339_v42 }
 0x1c6   :  { %v334_v43 = vpop.f32.mrf.mxu2 }
 0x235   :  { %v341_v44 = vpop.xlane.xlu0 %340 }
 0x236   :  { %v342_v45 = vsub.f32 %v339_v42, %v341_v44 }
 0x238   :  { %v343_v46 = vmul.f32 1.442695, %v342_v45 }
 0x23a   :  { %512 = vpow2.f32 %v343_v46 }
 0x240   :  { %v513_v47 = vpop.eup %512 }
 0x241   :  { %345 = vadd.xlane.f32.xlu0 %v513_v47 }
 0x2b4   :  { %v346_v48 = vpop.xlane.xlu0 %345 }
 0x2b5   :  { %514 = vrcp.f32 %v346_v48  ;;  %v358_v52 = vand.u32 2147483648, %v346_v48  ;;  %v356_v54 = vand.u32 2147483647, %v346_v48  ;;  %vm352_vm2 = vweird.f32 %v346_v48 }
 0x2b7   :  { %v359_v56 = vor.u32 1.1754944e-38, %v358_v52  ;;  %vm357_vm4 = vcmp.eq.f32.partialorder %v356_v54, 8.507059e+37 }
 0x2bb   :  { %v515_v49 = vpop.eup %514 }
 0x2bc   :  { %v348_v50 = vmul.f32 %v515_v49, %v346_v48  ;;  %vm353_vm1 = vweird.f32 %v515_v49 }
 0x2bd   :  { %vm354_vm3 = vmor %vm352_vm2, %vm353_vm1 }
 0x2be   :  { %v349_v51 = vsub.f32 1.0, %v348_v50 }
 0x2c0   :  { %v350_v53 = vmul.f32 %v515_v49, %v349_v51 }
 0x2c2   :  { %v351_v55 = vadd.f32 %v515_v49, %v350_v53 }
 0x2c4   :  { %v355_v57 = vsel %vm354_vm3, %v515_v49, %v351_v55 }
 0x2c5   :  { %v360_v58 = vsel %vm357_vm4, %v359_v56, %v355_v57 }
 0x2c6   :  { %v361_v59 = vmul.f32 %v513_v47, %v360_v58 }
 0x2c8   :  { %362 = vst [vmem:[#allocation10] sm:$0xff] %v361_v59 }
 0x2c9   :  { %373 = dma.vmem_to_hbm [thread:$0]  %s369_s6, 128, %s371_s26, [#allocation4]  }
 0x2ca   :  { %642 = dma.done.wait [#allocation4], 128  }
 0x2cb   :  { %643 = vsyncadd [#allocation4], 4294967168 }
 0x2cc   :  { %378 = vsyncpa [#allocation3], 1 }
 0x2cd   :  { %379 = vsyncpa [#allocation6], 1 }
 0x2ce   :  { %380 = vsyncpa [#allocation9], 1 }
 0x2cf   :  { %381 = vsyncpa [#allocation4], 1 }

</bundles_post_ra>
